<compile_context>
chip_gen: v5e
topology: v5e:2x2
jax: 0.10.0
libtpu: 0.0.40
codegen_flags: <defaults>
</compile_context>

<pallas_src>
import functools

import jax
import jax.numpy as jnp
from jax.experimental import pallas as pl
from jax.experimental.pallas import tpu as pltpu

_LANE = 128
_SUB = 8


def _masked_mean_kernel(hidden_ref, mask_ref, out_ref, acc_ref, cnt_ref,
                        *, seq_len, seq_block):
    """Grid = (batch tiles, hidden tiles, seq tiles); seq (last) is the reduction.

    hidden_ref: (bt, st, dt)   input dtype (bf16 / f32 ...)
    mask_ref:   (bt, st)       float32 mask
    out_ref:    (bt, dt)       promoted output dtype
    acc_ref:    (bt, dt) f32   running masked sum   (VMEM scratch)
    cnt_ref:    (bt, 1)  f32   running token count  (VMEM scratch)
    """
    s = pl.program_id(2)
    ns = pl.num_programs(2)

    @pl.when(s == 0)
    def _init():
        acc_ref[...] = jnp.zeros_like(acc_ref)
        cnt_ref[...] = jnp.zeros_like(cnt_ref)

    h = hidden_ref[...]            # keep input dtype -> straight into the MXU
    m = mask_ref[...]              # (bt, st) f32

    def _accumulate(h_blk, m_blk):
        # Masked sum over the sequence on the MXU: batched [1, st] @ [st, dt].
        w = m_blk.astype(h_blk.dtype)[:, None, :]                 # (bt, 1, st)
        p = jnp.einsum("bqs,bsd->bqd", w, h_blk,
                       preferred_element_type=jnp.float32)        # (bt, 1, dt)
        acc_ref[...] += p[:, 0, :]
        cnt_ref[...] += jnp.sum(m_blk, axis=1, keepdims=True)     # (bt, 1)

    if seq_len % seq_block != 0:
        # Last sequence block is partial: rows beyond S hold unspecified VMEM
        # contents, so zero both the mask and the hidden rows before reducing.
        @pl.when(s == ns - 1)
        def _tail():
            idx = s * seq_block + jax.lax.broadcasted_iota(jnp.int32, m.shape, 1)
            valid = idx < seq_len
            _accumulate(jnp.where(valid[:, :, None], h, jnp.zeros_like(h)),
                        jnp.where(valid, m, jnp.zeros_like(m)))

        @pl.when(s < ns - 1)
        def _body():
            _accumulate(h, m)
    else:
        _accumulate(h, m)

    @pl.when(s == ns - 1)
    def _finalize():
        cnt = jnp.maximum(cnt_ref[...], 1e-9)          # torch clamp(min=1e-9)
        out_ref[...] = (acc_ref[...] / cnt).astype(out_ref.dtype)


def _mean_kernel(hidden_ref, out_ref, acc_ref, *, seq_len, seq_block):
    """attention_mask=None path: plain mean over the sequence dimension."""
    s = pl.program_id(2)
    ns = pl.num_programs(2)

    @pl.when(s == 0)
    def _init():
        acc_ref[...] = jnp.zeros_like(acc_ref)

    h = hidden_ref[...]

    def _accumulate(h_blk, w_blk):
        p = jnp.einsum("bqs,bsd->bqd", w_blk[:, None, :], h_blk,
                       preferred_element_type=jnp.float32)        # (bt, 1, dt)
        acc_ref[...] += p[:, 0, :]

    if seq_len % seq_block != 0:
        @pl.when(s == ns - 1)
        def _tail():
            idx = s * seq_block + jax.lax.broadcasted_iota(jnp.int32, h.shape[:2], 1)
            valid = idx < seq_len
            _accumulate(jnp.where(valid[:, :, None], h, jnp.zeros_like(h)),
                        valid.astype(h.dtype))

        @pl.when(s < ns - 1)
        def _body():
            _accumulate(h, jnp.ones(h.shape[:2], h.dtype))
    else:
        _accumulate(h, jnp.ones(h.shape[:2], h.dtype))

    @pl.when(s == ns - 1)
    def _finalize():
        out_ref[...] = (acc_ref[...] / seq_len).astype(out_ref.dtype)


def _vmem_budget():
    """(hidden-block budget bytes, vmem_limit_bytes) tuned per TPU generation."""
    try:
        cap = pltpu.get_tpu_info().vmem_capacity_bytes
    except Exception:
        cap = None
    if cap is None:
        return 8 * 1024 * 1024, 32 * 1024 * 1024          # conservative fallback
    if cap < 100 * 1024 * 1024:
        return 8 * 1024 * 1024, 48 * 1024 * 1024          # v7x: 64 MiB per TC
    return 16 * 1024 * 1024, 64 * 1024 * 1024             # v5e / v6e: 128 MiB


def _choose_tiles(B, S, D, itemsize, budget):
    """Pick (bt, st, dt) with no host-side padding needed.

    dt is the full D (split in two lane-aligned halves only when the batch axis
    has a single block, so both v7x TensorCores get work); st is the full S when
    the block fits the budget, otherwise a multiple of 128 (the mask block's
    lane dim) with the tail handled in-kernel; bt is a multiple of 8 (partial
    batch tail blocks are harmless because batch rows never mix).
    """
    if B <= _SUB:
        bt = B
    else:
        bt = min(64, (B // _SUB) * _SUB)

    dt = D
    if pl.cdiv(B, bt) < 2 and D >= 2 * _LANE and D % (2 * _LANE) == 0:
        dt = D // 2

    def fits(bt_, st_):
        return bt_ * st_ * dt * itemsize <= budget

    def seq_tile(bt_):
        if fits(bt_, S) or S <= _LANE:
            return S
        rows = budget // (bt_ * dt * itemsize)
        return min(S, max(_LANE, (rows // _LANE) * _LANE))

    st = seq_tile(bt)
    while bt > _SUB and not fits(bt, st):
        bt = max(_SUB, ((bt // 2) // _SUB) * _SUB)
        st = seq_tile(bt)
    return bt, st, dt


def mean_pooling_with_mask(last_hidden_state, attention_mask=None):
    """JAX/Pallas equivalent of MeanPoolingWithMask.forward.

    last_hidden_state: [B, S, D] float array
    attention_mask:    [B, S] (bool / int / float) or None
    returns:           [B, D]
    """
    B, S, D = last_hidden_state.shape
    in_dtype = last_hidden_state.dtype
    itemsize = jnp.dtype(in_dtype).itemsize

    budget, vmem_limit = _vmem_budget()
    bt, st, dt = _choose_tiles(B, S, D, itemsize, budget)
    grid = (pl.cdiv(B, bt), D // dt, pl.cdiv(S, st))

    compiler_params = pltpu.CompilerParams(
        dimension_semantics=("parallel", "parallel", "arbitrary"),
        vmem_limit_bytes=vmem_limit,
    )
    hidden_spec = pl.BlockSpec((bt, st, dt), lambda b, d, s: (b, s, d))
    out_spec = pl.BlockSpec((bt, dt), lambda b, d, s: (b, d))

    if attention_mask is None:
        # torch.mean over dim=1: no mask DMA, divide by the static S.
        kernel = functools.partial(_mean_kernel, seq_len=S, seq_block=st)
        return pl.pallas_call(
            kernel,
            out_shape=jax.ShapeDtypeStruct((B, D), in_dtype),
            grid_spec=pltpu.PrefetchScalarGridSpec(
                num_scalar_prefetch=0,
                grid=grid,
                in_specs=[hidden_spec],
                out_specs=out_spec,
                scratch_shapes=[pltpu.VMEM((bt, dt), jnp.float32)],
            ),
            compiler_params=compiler_params,
        )(last_hidden_state)

    # torch promotes via input_mask_expanded.float() -> f32 result.
    out_dtype = jnp.promote_types(in_dtype, jnp.float32)
    mask_f32 = attention_mask.astype(jnp.float32)          # tiny [B, S] array

    kernel = functools.partial(_masked_mean_kernel, seq_len=S, seq_block=st)
    return pl.pallas_call(
        kernel,
        out_shape=jax.ShapeDtypeStruct((B, D), out_dtype),
        grid_spec=pltpu.PrefetchScalarGridSpec(
            num_scalar_prefetch=0,
            grid=grid,
            in_specs=[
                hidden_spec,
                pl.BlockSpec((bt, st), lambda b, d, s: (b, s)),
            ],
            out_specs=out_spec,
            scratch_shapes=[
                pltpu.VMEM((bt, dt), jnp.float32),   # running masked sum
                pltpu.VMEM((bt, 1), jnp.float32),    # running token count
            ],
        ),
        compiler_params=compiler_params,
    )(last_hidden_state, mask_f32)


if __name__ == "__main__":
    key = jax.random.PRNGKey(0)
    k1, _ = jax.random.split(key)

    B, S, D = 2, 8, 32
    last_hidden_state = jax.random.normal(k1, (B, S, D), dtype=jnp.float32)
    # Deterministic mask: first row keeps 5 tokens, second keeps 3.
    lengths = jnp.array([5, 3], dtype=jnp.int32)
    attention_mask = (jnp.arange(S)[None, :] < lengths[:, None]).astype(jnp.int32)

    out_masked = jax.block_until_ready(
        mean_pooling_with_mask(last_hidden_state, attention_mask))
    out_plain = jax.block_until_ready(
        mean_pooling_with_mask(last_hidden_state, None))

    # Pure-JAX reference.
    m = attention_mask.astype(jnp.float32)[:, :, None]
    ref_masked = (last_hidden_state * m).sum(axis=1) / jnp.maximum(m.sum(axis=1), 1e-9)
    ref_plain = last_hidden_state.mean(axis=1)

    assert out_masked.shape == (B, D)
    assert out_plain.shape == (B, D)
    assert jnp.allclose(out_masked, ref_masked, atol=1e-5, rtol=1e-5)
    assert jnp.allclose(out_plain, ref_plain, atol=1e-5, rtol=1e-5)

    print("KERNEL_OK")
</pallas_src>

<mosaic_0001>
module attributes {stable_mosaic.version = 11 : i64} {
  func.func @_masked_mean_kernel(%arg0: i32, %arg1: i32, %arg2: i32, %arg3: memref<2x8x32xf32, #tpu.memory_space<vmem>>, %arg4: memref<2x8xf32, #tpu.memory_space<vmem>>, %arg5: memref<2x32xf32, #tpu.memory_space<vmem>>, %arg6: memref<2x32xf32, #tpu.memory_space<vmem>>, %arg7: memref<2x1xf32, #tpu.memory_space<vmem>>) attributes {dimension_semantics = [#tpu.dimension_semantics<parallel>, #tpu.dimension_semantics<parallel>, #tpu.dimension_semantics<arbitrary>], iteration_bounds = array<i64: 1, 1, 1>, scalar_prefetch = 0 : i64, scratch_operands = 2 : i64, tpu.core_type = #tpu.core_type<tc>, window_params = [{transform_indices = @transform_0, window_bounds = array<i64: 2, 8, 32>}, {transform_indices = @transform_1, window_bounds = array<i64: 2, 8>}, {transform_indices = @transform_2, window_bounds = array<i64: 2, 32>}]} {
    %c0_i32 = arith.constant 0 : i32
    %0 = arith.cmpi eq, %arg2, %c0_i32 : i32
    %1 = arith.extui %0 : i1 to i32
    %c0_i32_0 = arith.constant 0 : i32
    %2 = arith.cmpi ne, %1, %c0_i32_0 : i32
    scf.if %2 {
      %cst_16 = arith.constant 0.000000e+00 : f32
      %19 = vector.broadcast %cst_16 : f32 to vector<2x32xf32>
      %c0_17 = arith.constant 0 : index
      %c0_18 = arith.constant 0 : index
      %20 = vector.load %arg6[%c0_17, %c0_18] : memref<2x32xf32, #tpu.memory_space<vmem>>, vector<2x32xf32>
      tpu.vector_store %arg6[%c0_17, %c0_18], %19 {strides = array<i32>} : memref<2x32xf32, #tpu.memory_space<vmem>>, vector<2x32xf32>,
      %cst_19 = arith.constant 0.000000e+00 : f32
      %21 = vector.broadcast %cst_19 : f32 to vector<2x1xf32>
      %c0_20 = arith.constant 0 : index
      %c0_21 = arith.constant 0 : index
      %22 = vector.load %arg7[%c0_20, %c0_21] : memref<2x1xf32, #tpu.memory_space<vmem>>, vector<2x1xf32>
      tpu.vector_store %arg7[%c0_20, %c0_21], %21 {strides = array<i32>} : memref<2x1xf32, #tpu.memory_space<vmem>>, vector<2x1xf32>,
    } else {
    }
    %c0 = arith.constant 0 : index
    %c0_1 = arith.constant 0 : index
    %c0_2 = arith.constant 0 : index
    %3 = vector.load %arg3[%c0, %c0_1, %c0_2] : memref<2x8x32xf32, #tpu.memory_space<vmem>>, vector<2x8x32xf32>
    %c0_3 = arith.constant 0 : index
    %c0_4 = arith.constant 0 : index
    %4 = vector.load %arg4[%c0_3, %c0_4] : memref<2x8xf32, #tpu.memory_space<vmem>>, vector<2x8xf32>
    %5 = vector.shape_cast %4 : vector<2x8xf32> to vector<2x1x8xf32>
    "tpu.trace_start"() <{level = 10 : i32, message = "bqs,bsd->bqd"}> : () -> ()
    %cst = arith.constant dense<0.000000e+00> : vector<2x1x32xf32>
    %6 = tpu.matmul %5, %3, %cst {dimension_numbers = #tpu.dot_dimension_numbers<[2], [1], [1], [2], [0, 0, 0, 1, 1, 2], [0], [0]>} : vector<2x1x8xf32>, vector<2x8x32xf32>, vector<2x1x32xf32> -> vector<2x1x32xf32>
    "tpu.trace_stop"() : () -> ()
    %c0_5 = arith.constant 0 : index
    %c0_6 = arith.constant 0 : index
    %7 = vector.load %arg6[%c0_5, %c0_6] : memref<2x32xf32, #tpu.memory_space<vmem>>, vector<2x32xf32>
    %8 = vector.shape_cast %6 : vector<2x1x32xf32> to vector<2x32xf32>
    %9 = arith.addf %7, %8 : vector<2x32xf32>
    %c0_7 = arith.constant 0 : index
    %c0_8 = arith.constant 0 : index
    %10 = vector.load %arg6[%c0_7, %c0_8] : memref<2x32xf32, #tpu.memory_space<vmem>>, vector<2x32xf32>
    tpu.vector_store %arg6[%c0_7, %c0_8], %9 {strides = array<i32>} : memref<2x32xf32, #tpu.memory_space<vmem>>, vector<2x32xf32>,
    %c0_9 = arith.constant 0 : index
    %c0_10 = arith.constant 0 : index
    %11 = vector.load %arg7[%c0_9, %c0_10] : memref<2x1xf32, #tpu.memory_space<vmem>>, vector<2x1xf32>
    %cst_11 = arith.constant dense<0.000000e+00> : vector<2xf32>
    %12 = vector.multi_reduction <add>, %4, %cst_11 [1] : vector<2x8xf32> to vector<2xf32>
    %13 = vector.shape_cast %12 : vector<2xf32> to vector<2x1xf32>
    %14 = arith.addf %11, %13 : vector<2x1xf32>
    %c0_12 = arith.constant 0 : index
    %c0_13 = arith.constant 0 : index
    %15 = vector.load %arg7[%c0_12, %c0_13] : memref<2x1xf32, #tpu.memory_space<vmem>>, vector<2x1xf32>
    tpu.vector_store %arg7[%c0_12, %c0_13], %14 {strides = array<i32>} : memref<2x1xf32, #tpu.memory_space<vmem>>, vector<2x1xf32>,
    %c0_i32_14 = arith.constant 0 : i32
    %16 = arith.cmpi eq, %arg2, %c0_i32_14 : i32
    %17 = arith.extui %16 : i1 to i32
    %c0_i32_15 = arith.constant 0 : i32
    %18 = arith.cmpi ne, %17, %c0_i32_15 : i32
    scf.if %18 {
      %c0_16 = arith.constant 0 : index
      %c0_17 = arith.constant 0 : index
      %19 = vector.load %arg7[%c0_16, %c0_17] : memref<2x1xf32, #tpu.memory_space<vmem>>, vector<2x1xf32>
      %cst_18 = arith.constant 9.99999971E-10 : f32
      %20 = vector.broadcast %cst_18 : f32 to vector<2x1xf32>
      %21 = arith.maximumf %19, %20 : vector<2x1xf32>
      %c0_19 = arith.constant 0 : index
      %c0_20 = arith.constant 0 : index
      %22 = vector.load %arg6[%c0_19, %c0_20] : memref<2x32xf32, #tpu.memory_space<vmem>>, vector<2x32xf32>
      %23 = vector.broadcast %21 : vector<2x1xf32> to vector<2x32xf32>
      %24 = arith.divf %22, %23 : vector<2x32xf32>
      %c0_21 = arith.constant 0 : index
      %c0_22 = arith.constant 0 : index
      %25 = vector.load %arg5[%c0_21, %c0_22] : memref<2x32xf32, #tpu.memory_space<vmem>>, vector<2x32xf32>
      tpu.vector_store %arg5[%c0_21, %c0_22], %24 {strides = array<i32>} : memref<2x32xf32, #tpu.memory_space<vmem>>, vector<2x32xf32>,
    } else {
    }
    return
  }
  func.func @transform_0(%arg0: i32, %arg1: i32, %arg2: i32) -> (i32, i32, i32) {
    %c0_i32 = arith.constant 0 : i32
    return %arg0, %arg2, %arg1 : i32, i32, i32
  }
  func.func @transform_1(%arg0: i32, %arg1: i32, %arg2: i32) -> (i32, i32) {
    %c0_i32 = arith.constant 0 : i32
    return %arg0, %arg2 : i32, i32
  }
  func.func @transform_2(%arg0: i32, %arg1: i32, %arg2: i32) -> (i32, i32) {
    %c0_i32 = arith.constant 0 : i32
    return %arg0, %arg1 : i32, i32
  }
}

</mosaic_0001>

<bundles_post_ra>
// kernel: tpu_custom_call.1
= control target key start
LH: loop header
LB: loop body
LE: loop exit
PB: predicated region body
PF: predicated region fallthrough
CT: control target
= control target key end

     0   :  { %7 = vsyncpa [#allocation5], 0  ;;  %s289_s0 = inlined_call_operand.hbm [shape: f32[2,8,32], index: 0, kind: input, shape index: {}]   ;;  %s290_s1 = inlined_call_operand.hbm [shape: f32[2,8], index: 1, kind: input, shape index: {}]   ;;  %s291_s2 = inlined_call_operand.hbm [shape: f32[2,32], index: 2, kind: output, shape index: {}]  }
   0x1   :  { %8 = vsyncpa [#allocation8], 0 }
   0x2   :  { %9 = vsyncpa [#allocation6], 0  ;;  %s14_s11 = sshll.u32 %s289_s0, 4  ;;  %s253_s12 = smov [#allocation4]   ;;  %s15_s11 = int_to_ptr.hbm [resolvable:$true] %s14_s11 }
   0x3   :  { %s16_s13 = sshll.u32 %s253_s12, 4  ;;  %s28_s16 = sshll.u32 %s290_s1, 4  ;;  %s17_s13 = int_to_ptr.vmem [resolvable:$true] %s16_s13  ;;  %s29_s16 = int_to_ptr.hbm [resolvable:$true] %s28_s16 }
   0x4   :  { %s254_s17 = smov 128   ;;  %s255_s18 = smov 8  }
   0x5   :  { %22 = dma.hbm_to_vmem [thread:$0]  %s15_s11, 256, %s17_s13, [#allocation5], %s254_s17, %s254_s17, %s255_s18  }
   0x6   :  { %s256_s19 = smov [#allocation7]  }
   0x7   :  { %s30_s20 = sshll.u32 %s256_s19, 4  ;;  %s31_s20 = int_to_ptr.vmem [resolvable:$true] %s30_s20 }
   0x8   :  { %33 = dma.hbm_to_vmem [thread:$0]  %s29_s16, 32, %s31_s20, [#allocation8]  }
   0x9   :  { %247 = dma.done.wait [#allocation5], 256  }
   0xa   :  { %248 = vsyncadd [#allocation5], 4294967040 }
   0xb   :  { %249 = dma.done.wait [#allocation8], 32  }
   0xc   :  { %250 = vsyncadd [#allocation8], 4294967264  ;;  %vm48_vm0 = vcmask 1024   ;;  %v257_v0 = vmov 0.0   ;;  %vm111_vm1 = vcmask 58368   ;;  %v51_v3 = vld [vmem:[#allocation4 + $0x8] sm:$0xff] }
   0xd   :  { %49 = vst.msk [vmem:[#allocation3] sm:$0x3] %vm48_vm0, %v257_v0  ;;  %v52_v1 = vld [vmem:[#allocation7] sm:$0x3]  ;;  %vm55_vm2 = vcmask 64512   ;;  %v50_v5 = vld [vmem:[#allocation4] sm:$0xff]  ;;  %95 = vmatpush.msra.mxu1 %v51_v3 }
   0xe   :  { %v112_v2 = vsel %vm111_vm1, %v52_v1, 0.0  ;;  %v54_v4 = vrot.slane %v52_v1, 1  ;;  %73 = vmatpush.msra.mxu0 %v50_v5  ;;  %v258_v6 = vmov 0   ;;  %vm46_vm3 = vcmask 254976   ;;  %s259_s0 = smov [#allocation9]   ;;  %s152_s23 = sshll.u32 %s291_s2, 4  ;;  %s153_s23 = int_to_ptr.hbm [resolvable:$true] %s152_s23 }
   0xf   :  { %113 = vadd.xlane.f32.xlu0 %v112_v2  ;;  %163 = vmatmul.msk.f32.vlgmr.msra.gmra.mxu0 %vm55_vm2, %v52_v1  ;;  %47 = vst.msk [vmem:[#allocation2] sm:$0x3] %vm46_vm3, %v257_v0  ;;  %vm104_vm4 = vcmask 1041409   ;;  %s150_s1 = sshll.u32 %s259_s0, 4  ;;  %s151_s1 = int_to_ptr.vmem [resolvable:$true] %s150_s1 }
  0x10   :  { %164 = vmatmul.msk.f32.vlgmr.msra.gmra.mxu1 %vm55_vm2, %v54_v4  ;;  %172 = vset.pattern.permute.xlu0 %v258_v6 }
  0x14   :  { %v110_v7 = vld [vmem:[#allocation3] sm:$0x3] }
  0x16   :  { %v100_v15 = vld [vmem:[#allocation2] sm:$0x3] }
  0x82   :  { %v114_v8 = vpop.xlane.xlu0 %113 }
  0x83   :  { %v115_v9 = vadd.f32 %v114_v8, %v110_v7 }
  0x85   :  { %117 = vst.msk [vmem:[#allocation3] sm:$0x3] %vm48_vm0, %v115_v9 }
  0x8c   :  { %v121_v10 = vld [vmem:[#allocation3] sm:$0x3]  ;;  %v75_v14 = vpop.f32.mrf.mxu0 }
  0x8d   :  { %v122_v11 = vmax.f32 %v121_v10, 1e-09  ;;  %v97_v12 = vpop.f32.mrf.mxu1 }
  0x8e   :  { %v103_v13 = vrot.slane %v97_v12, 7 }
  0x8f   :  { %126 = vperm.xlu0 %172, %v122_v11  }
  0x90   :  { %v105_v16 = vsel %vm104_vm4, %v103_v13, %v75_v14 }
  0x91   :  { %v107_v17 = vadd.f32 %v105_v16, %v100_v15 }
  0x93   :  { %109 = vst.msk [vmem:[#allocation2] sm:$0x3] %vm46_vm3, %v107_v17 }
  0x9a   :  { %v123_v27 = vld [vmem:[#allocation2] sm:$0x3] }
 0x101   :  { %v127_v18 = vpop.permute.xlu0 %126 }
 0x102   :  { %173 = vrcp.f32 %v127_v18  ;;  %v140_v22 = vand.u32 2147483648, %v127_v18  ;;  %v138_v24 = vand.u32 2147483647, %v127_v18  ;;  %vm134_vm6 = vweird.f32 %v127_v18 }
 0x104   :  { %v141_v26 = vor.u32 1.1754944e-38, %v140_v22  ;;  %vm139_vm8 = vcmp.eq.f32.partialorder %v138_v24, 8.507059e+37 }
 0x108   :  { %v174_v19 = vpop.eup %173 }
 0x109   :  { %v130_v20 = vmul.f32 %v174_v19, %v127_v18  ;;  %vm135_vm5 = vweird.f32 %v174_v19 }
 0x10a   :  { %vm136_vm7 = vmor %vm134_vm6, %vm135_vm5 }
 0x10b   :  { %v131_v21 = vsub.f32 1.0, %v130_v20 }
 0x10d   :  { %v132_v23 = vmul.f32 %v174_v19, %v131_v21 }
 0x10f   :  { %v133_v25 = vadd.f32 %v174_v19, %v132_v23 }
 0x111   :  { %v137_v28 = vsel %vm136_vm7, %v174_v19, %v133_v25 }
 0x112   :  { %v142_v29 = vsel %vm139_vm8, %v141_v26, %v137_v28 }
 0x113   :  { %v143_v30 = vmul.f32 %v142_v29, %v123_v27 }
 0x115   :  { %144 = vst.msk [vmem:[#allocation9] sm:$0x3] %vm46_vm3, %v143_v30 }
 0x116   :  { %155 = dma.vmem_to_hbm [thread:$0]  %s151_s1, 32, %s153_s23, [#allocation6]  }
 0x117   :  { %251 = dma.done.wait [#allocation6], 32  }
 0x118   :  { %252 = vsyncadd [#allocation6], 4294967264 }
 0x119   :  { %160 = vsyncpa [#allocation5], 1 }
 0x11a   :  { %161 = vsyncpa [#allocation8], 1 }
 0x11b   :  { %162 = vsyncpa [#allocation6], 1 }

</bundles_post_ra>
